<compile_context>
chip_gen: v6e
topology: v6e:2x2x1
jax: 0.10.0
libtpu: 0.0.40
codegen_flags: <defaults>
</compile_context>

<pallas_src>
import functools

import jax
import jax.numpy as jnp
from jax.experimental import pallas as pl
from jax.experimental.pallas import tpu as pltpu


def _round_up(n, m):
    return pl.cdiv(n, m) * m


def _lane_pad(n_outputs):
    # Pad the output/lane axis to a multiple of 128 only when O is already
    # >= 128 and ragged; for small O the padding inflates output HBM writes
    # (and forces a post-kernel slice) far more than the masked vst it saves.
    if n_outputs >= 128 and n_outputs % 128 != 0:
        return _round_up(n_outputs, 128)
    return n_outputs


def _linear_kernel(x_ref, w_ref, b_ref, o_ref):
    # MXU matmul with f32 accumulation; bias add + cast on the VPU in f32.
    acc = jnp.dot(
        x_ref[...],
        w_ref[...],
        preferred_element_type=jnp.float32,
        precision=jax.lax.Precision.HIGHEST,
    )
    o_ref[...] = (acc + b_ref[...].astype(jnp.float32)).astype(o_ref.dtype)


@functools.lru_cache(maxsize=None)
def _build_linear_call(B, H, O_pad, tb, out_dtype, vmem_limit_bytes,
                       single_buffer_weights):
    grid = (pl.cdiv(B, tb),)  # ragged last tile is masked by Pallas
    w_kwargs = {}
    b_kwargs = {}
    if single_buffer_weights:
        # W / b have constant index_maps: double-buffering them buys nothing,
        # so keep a single resident copy and spend the VMEM on larger x tiles.
        w_kwargs = dict(pipeline_mode=pl.Buffered(1))
        b_kwargs = dict(pipeline_mode=pl.Buffered(1))
    return pl.pallas_call(
        _linear_kernel,
        out_shape=jax.ShapeDtypeStruct((B, O_pad), out_dtype),
        grid=grid,
        in_specs=[
            pl.BlockSpec((tb, H), lambda i: (i, 0)),                  # stream x
            pl.BlockSpec((H, O_pad), lambda i: (0, 0), **w_kwargs),   # resident W
            pl.BlockSpec((1, O_pad), lambda i: (0, 0), **b_kwargs),   # resident b
        ],
        out_specs=pl.BlockSpec((tb, O_pad), lambda i: (i, 0)),
        compiler_params=pltpu.CompilerParams(
            dimension_semantics=("parallel",),
            vmem_limit_bytes=vmem_limit_bytes,
        ),
    )


def receiver_forward(x, w_p, b_p, *, n_outputs=None, tb=None):
    """y = x @ w_p + b_p, sliced to n_outputs columns if w_p was lane-padded.

    x:   [B, n_hidden]
    w_p: [n_hidden, O_pad]  (nn.Linear weight, pre-transposed; pre-padded at
                             init time only when that is worthwhile)
    b_p: [1, O_pad]
    returns [B, n_outputs]
    """
    B, H = x.shape
    H2, O_pad = w_p.shape
    assert H == H2 and b_p.shape == (1, O_pad)
    if n_outputs is None:
        n_outputs = O_pad

    if tb is None:
        # Large streaming tile (multiple of 8 sublanes), capped at 512 rows.
        tb = min(512, _round_up(B, 8))
        # v7x megacore: make sure the "parallel" batch axis has >= 2 tiles
        # once B is big enough; no effect on single-TC v5e/v6e.
        if B >= 16 and pl.cdiv(B, tb) < 2:
            tb = _round_up(pl.cdiv(B, 2), 8)

    itemsize = jnp.dtype(x.dtype).itemsize
    # Resident W + b, double-buffered x/out tiles, 2x slack; capped under
    # v7x's 64 MiB physical VMEM (v5e/v6e have 128 MiB physical).
    budget = (H * O_pad + O_pad) * itemsize + 2 * tb * (H + O_pad) * itemsize
    vmem_limit = int(min(max(2 * budget, 16 << 20), 48 << 20))

    dtype = jnp.dtype(x.dtype)
    try:
        out = _build_linear_call(B, H, O_pad, tb, dtype, vmem_limit,
                                 True)(x, w_p, b_p)
    except Exception:
        # pipeline_mode=pl.Buffered(1) unsupported on this lowering path:
        # fall back to default double buffering (correctness identical).
        out = _build_linear_call(B, H, O_pad, tb, dtype, vmem_limit,
                                 False)(x, w_p, b_p)

    if n_outputs != O_pad:
        out = out[:, :n_outputs]  # only taken for large, ragged O
    return out


def init_receiver_params(key, n_hidden, n_outputs, dtype=jnp.float32):
    """nn.Linear-style uniform(-1/sqrt(fan_in), +) init.

    The weight is stored pre-transposed as [n_hidden, O_pad] (and pre-padded
    on the lane axis only when that pays off), so the forward path does no
    per-step weight reshaping/padding.
    """
    kw, kb = jax.random.split(key)
    bound = 1.0 / (n_hidden ** 0.5)
    w_t = jax.random.uniform(kw, (n_hidden, n_outputs), dtype, -bound, bound)
    b = jax.random.uniform(kb, (1, n_outputs), dtype, -bound, bound)
    o_pad = _lane_pad(n_outputs)
    if o_pad != n_outputs:
        w_t = jnp.zeros((n_hidden, o_pad), dtype).at[:, :n_outputs].set(w_t)
        b = jnp.zeros((1, o_pad), dtype).at[:, :n_outputs].set(b)
    return w_t, b


if __name__ == "__main__":
    key = jax.random.PRNGKey(0)
    k_x, k_p = jax.random.split(key)

    batch = 8
    n_hidden = 32
    n_outputs = 16

    x = jax.random.normal(k_x, (batch, n_hidden), jnp.float32)
    w_p, b_p = init_receiver_params(k_p, n_hidden, n_outputs)

    y = receiver_forward(x, w_p, b_p, n_outputs=n_outputs)
    jax.block_until_ready(y)

    # Reference check against plain JAX (same math as torch's F.linear).
    y_ref = x @ w_p[:, :n_outputs] + b_p[:, :n_outputs]
    assert y.shape == (batch, n_outputs)
    assert jnp.allclose(y, y_ref, atol=1e-5, rtol=1e-5)

    print("KERNEL_OK")
</pallas_src>

<mosaic_0001>
module attributes {stable_mosaic.version = 11 : i64} {
  func.func @_linear_kernel(%arg0: i32, %arg1: memref<8x32xf32, #tpu.memory_space<vmem>>, %arg2: memref<32x16xf32, #tpu.memory_space<vmem>>, %arg3: memref<1x16xf32, #tpu.memory_space<vmem>>, %arg4: memref<8x16xf32, #tpu.memory_space<vmem>>) attributes {dimension_semantics = [#tpu.dimension_semantics<parallel>], iteration_bounds = array<i64: 1>, scalar_prefetch = 0 : i64, scratch_operands = 0 : i64, tpu.core_type = #tpu.core_type<tc>, window_params = [{transform_indices = @transform_0, window_bounds = array<i64: 8, 32>}, {pipeline_mode = #tpu.pipeline_mode<synchronous>, transform_indices = @transform_1, window_bounds = array<i64: 32, 16>}, {pipeline_mode = #tpu.pipeline_mode<synchronous>, transform_indices = @transform_2, window_bounds = array<i64: 1, 16>}, {transform_indices = @transform_3, window_bounds = array<i64: 8, 16>}]} {
    %c0 = arith.constant 0 : index
    %c0_0 = arith.constant 0 : index
    %0 = vector.load %arg1[%c0, %c0_0] : memref<8x32xf32, #tpu.memory_space<vmem>>, vector<8x32xf32>
    %c0_1 = arith.constant 0 : index
    %c0_2 = arith.constant 0 : index
    %1 = vector.load %arg2[%c0_1, %c0_2] : memref<32x16xf32, #tpu.memory_space<vmem>>, vector<32x16xf32>
    %cst = arith.constant dense<0.000000e+00> : vector<8x16xf32>
    %2 = tpu.matmul %0, %1, %cst {dimension_numbers = #tpu.dot_dimension_numbers<[1], [0], [0], [1], [0, 0, 1, 1], [], []>, precision = #tpu.contract_precision<fp32>} : vector<8x32xf32>, vector<32x16xf32>, vector<8x16xf32> -> vector<8x16xf32>
    %c0_3 = arith.constant 0 : index
    %c0_4 = arith.constant 0 : index
    %3 = vector.load %arg3[%c0_3, %c0_4] : memref<1x16xf32, #tpu.memory_space<vmem>>, vector<1x16xf32>
    %4 = vector.broadcast %3 : vector<1x16xf32> to vector<8x16xf32>
    %5 = arith.addf %2, %4 : vector<8x16xf32>
    %c0_5 = arith.constant 0 : index
    %c0_6 = arith.constant 0 : index
    %6 = vector.load %arg4[%c0_5, %c0_6] : memref<8x16xf32, #tpu.memory_space<vmem>>, vector<8x16xf32>
    tpu.vector_store %arg4[%c0_5, %c0_6], %5 {strides = array<i32>} : memref<8x16xf32, #tpu.memory_space<vmem>>, vector<8x16xf32>,
    return
  }
  func.func @transform_0(%arg0: i32) -> (i32, i32) {
    %c0_i32 = arith.constant 0 : i32
    %c0_i32_0 = arith.constant 0 : i32
    return %arg0, %c0_i32 : i32, i32
  }
  func.func @transform_1(%arg0: i32) -> (i32, i32) {
    %c0_i32 = arith.constant 0 : i32
    %c0_i32_0 = arith.constant 0 : i32
    %c0_i32_1 = arith.constant 0 : i32
    return %c0_i32, %c0_i32_0 : i32, i32
  }
  func.func @transform_2(%arg0: i32) -> (i32, i32) {
    %c0_i32 = arith.constant 0 : i32
    %c0_i32_0 = arith.constant 0 : i32
    %c0_i32_1 = arith.constant 0 : i32
    return %c0_i32, %c0_i32_0 : i32, i32
  }
  func.func @transform_3(%arg0: i32) -> (i32, i32) {
    %c0_i32 = arith.constant 0 : i32
    %c0_i32_0 = arith.constant 0 : i32
    return %arg0, %c0_i32 : i32, i32
  }
}

module attributes {stable_mosaic.version = 11 : i64} {
  func.func @_linear_kernel(%arg0: i32, %arg1: memref<8x32xf32, #tpu.memory_space<vmem>>, %arg2: memref<32x16xf32, #tpu.memory_space<vmem>>, %arg3: memref<1x16xf32, #tpu.memory_space<vmem>>, %arg4: memref<8x16xf32, #tpu.memory_space<vmem>>) attributes {dimension_semantics = [#tpu.dimension_semantics<parallel>], iteration_bounds = array<i64: 1>, scalar_prefetch = 0 : i64, scratch_operands = 0 : i64, tpu.core_type = #tpu.core_type<tc>, window_params = [{transform_indices = @transform_0, window_bounds = array<i64: 8, 32>}, {pipeline_mode = #tpu.pipeline_mode<synchronous>, transform_indices = @transform_1, window_bounds = array<i64: 32, 16>}, {pipeline_mode = #tpu.pipeline_mode<synchronous>, transform_indices = @transform_2, window_bounds = array<i64: 1, 16>}, {transform_indices = @transform_3, window_bounds = array<i64: 8, 16>}]} {
    %c0 = arith.constant 0 : index
    %c0_0 = arith.constant 0 : index
    %0 = vector.load %arg1[%c0, %c0_0] : memref<8x32xf32, #tpu.memory_space<vmem>>, vector<8x32xf32>
    %c0_1 = arith.constant 0 : index
    %c0_2 = arith.constant 0 : index
    %1 = vector.load %arg2[%c0_1, %c0_2] : memref<32x16xf32, #tpu.memory_space<vmem>>, vector<32x16xf32>
    %cst = arith.constant dense<0.000000e+00> : vector<8x16xf32>
    %2 = tpu.matmul %0, %1, %cst {dimension_numbers = #tpu.dot_dimension_numbers<[1], [0], [0], [1], [0, 0, 1, 1], [], []>, precision = #tpu.contract_precision<fp32>} : vector<8x32xf32>, vector<32x16xf32>, vector<8x16xf32> -> vector<8x16xf32>
    %c0_3 = arith.constant 0 : index
    %c0_4 = arith.constant 0 : index
    %3 = vector.load %arg3[%c0_3, %c0_4] : memref<1x16xf32, #tpu.memory_space<vmem>>, vector<1x16xf32>
    %4 = vector.broadcast %3 : vector<1x16xf32> to vector<8x16xf32>
    %5 = arith.addf %2, %4 : vector<8x16xf32>
    %c0_5 = arith.constant 0 : index
    %c0_6 = arith.constant 0 : index
    %6 = vector.load %arg4[%c0_5, %c0_6] : memref<8x16xf32, #tpu.memory_space<vmem>>, vector<8x16xf32>
    tpu.vector_store %arg4[%c0_5, %c0_6], %5 {strides = array<i32>} : memref<8x16xf32, #tpu.memory_space<vmem>>, vector<8x16xf32>,
    return
  }
  func.func @transform_0(%arg0: i32) -> (i32, i32) {
    %c0_i32 = arith.constant 0 : i32
    %c0_i32_0 = arith.constant 0 : i32
    return %arg0, %c0_i32 : i32, i32
  }
  func.func @transform_1(%arg0: i32) -> (i32, i32) {
    %c0_i32 = arith.constant 0 : i32
    %c0_i32_0 = arith.constant 0 : i32
    %c0_i32_1 = arith.constant 0 : i32
    return %c0_i32, %c0_i32_0 : i32, i32
  }
  func.func @transform_2(%arg0: i32) -> (i32, i32) {
    %c0_i32 = arith.constant 0 : i32
    %c0_i32_0 = arith.constant 0 : i32
    %c0_i32_1 = arith.constant 0 : i32
    return %c0_i32, %c0_i32_0 : i32, i32
  }
  func.func @transform_3(%arg0: i32) -> (i32, i32) {
    %c0_i32 = arith.constant 0 : i32
    %c0_i32_0 = arith.constant 0 : i32
    return %arg0, %c0_i32 : i32, i32
  }
}

</mosaic_0001>

<bundles_post_ra>
// kernel: tpu_custom_call.1
= control target key start
LH: loop header
LB: loop body
LE: loop exit
PB: predicated region body
PF: predicated region fallthrough
CT: control target
= control target key end

     0   :  { %vm27_vm0 = vcmask 261120   ;;  %v654_v3 = vmov 0.0   ;;  %vm655_vm1 = vmmov 0   ;;  %s764_s0 = inlined_call_operand.vmem [shape: f32[8,32], index: 0, kind: input, shape index: {}]   ;;  %s765_s1 = inlined_call_operand.vmem [shape: f32[32,16], index: 1, kind: input, shape index: {}]   ;;  %s766_s2 = inlined_call_operand.vmem [shape: f32[1,16], index: 2, kind: input, shape index: {}]   ;;  %s767_s3 = inlined_call_operand.hbm [shape: f32[8,16], index: 3, kind: output, shape index: {}]  }
   0x1   :  { %v19_v0 = vld [vmem:[%s765_s1 + $0x18] sm:$0xff]  ;;  %v18_v1 = vld [vmem:[%s765_s1 + $0x10] sm:$0xff]  ;;  %v17_v2 = vld [vmem:[%s765_s1 + $0x8] sm:$0xff]  ;;  %563 = vmatprep.subr.mxu0 %v654_v3  ;;  %574 = vmatprep.subr.mxu1 %v654_v3 }
   0x2   :  { %v687_v4 = vand.u32 4294901760, %v19_v0  ;;  %v689_v5 = vand.u32 4294901760, %v18_v1  ;;  %v691_v6 = vand.u32 4294901760, %v17_v2  ;;  %v16_v7 = vld [vmem:[%s765_s1] sm:$0xff]  ;;  %571 = vmatprep.mubr.msk.f32.mxu0 %vm655_vm1, %v654_v3  ;;  %582 = vmatprep.mubr.msk.f32.mxu1 %vm655_vm1, %v654_v3 }
   0x3   :  { %v15_v8 = vld [vmem:[%s764_s0] sm:$0xff]  ;;  %v700_v9 = vand.u32 4294901760, %v16_v7 }
   0x4   :  { %v29_v10 = vsel %vm27_vm0, %v15_v8, 0 }
   0x5   :  { %8 = vsyncpa [#allocation3], 0  ;;  %564 = vmatpush3.msra.mxu0 %v687_v4  ;;  %v136_v11 = vsub.f32 %v19_v0, %v687_v4  ;;  %v708_v12 = vand.u32 4294901760, %v29_v10  ;;  %v143_v13 = vsub.f32 %v18_v1, %v689_v5  ;;  %v150_v14 = vsub.f32 %v17_v2, %v691_v6  ;;  %v532_v35 = vld [vmem:[%s766_s2] ss:$0 sm:$0xff]  ;;  %s656_s22 = smov [#allocation2]  }
   0x6   :  { %565 = vmatprep.subr.mxu0 %v654_v3  ;;  %v157_v15 = vsub.f32 %v16_v7, %v700_v9  ;;  %s524_s23 = sshll.u32 %s656_s22, 4  ;;  %vm516_vm2 = vcmask 130048   ;;  %s525_s23 = int_to_ptr.vmem [resolvable:$true] %s524_s23 }
   0x7   :  { %566 = vmatpush3.msra.mxu0 %v689_v5  ;;  %v137_v16 = vand.u32 4294901760, %v136_v11  ;;  %v101_v17 = vsub.f32 %v29_v10, %v708_v12  ;;  %v144_v18 = vand.u32 4294901760, %v143_v13  ;;  %v151_v19 = vand.u32 4294901760, %v150_v14  ;;  %s632_s2 = scalar_lea.vmem %s525_s23, 128  ;;  %p637_p1 = scmp.lt.s32.totalorder %s525_s23, %s525_s23 }
   0x8   :  { %567 = vmatprep.subr.mxu0 %v654_v3  ;;  %v158_v20 = vand.u32 4294901760, %v157_v15  ;;  %p633_p0 = scmp.ne.s32.totalorder %s525_s23, %s632_s2  ;;  %p638_p2 = scmp.lt.s32.totalorder %s632_s2, %s632_s2 }
   0x9   :  { %568 = vmatpush3.msra.mxu0 %v691_v6  ;;  %v138_v21 = vsub.f32 %v136_v11, %v137_v16  ;;  %v102_v22 = vand.u32 4294901760, %v101_v17  ;;  %v145_v23 = vsub.f32 %v143_v13, %v144_v18  ;;  %v152_v24 = vsub.f32 %v150_v14, %v151_v19 }
   0xa   :  { %569 = vmatprep.subr.mxu0 %v654_v3  ;;  %v159_v28 = vsub.f32 %v157_v15, %v158_v20  ;;  %p639_p3 = por %p638_p2, %p637_p1 }
   0xb   :  { %570 = vmatpush3.msra.mxu0 %v700_v9  ;;  %v139_v25 = vand.u32 4294901760, %v138_v21  ;;  %v103_v26 = vsub.f32 %v101_v17, %v102_v22  ;;  %v146_v27 = vand.u32 4294901760, %v145_v23  ;;  %v153_v30 = vand.u32 4294901760, %v152_v24 }
   0xc   :  { %585 = vmatprep.subr.mxu0 %v654_v3  ;;  %v160_v31 = vand.u32 4294901760, %v159_v28  ;;  %p640_p4 = pnand %p639_p3, %p633_p0 }
   0xd   :  { %575 = vmatpush3.msra.mxu1 %v139_v25  ;;  %v104_v29 = vand.u32 4294901760, %v103_v26 }
   0xe   :  { %576 = vmatprep.subr.mxu1 %v654_v3 }
   0xf   :  { %572 = vmatmul.mubr.f32.vlgmr.msra.gmra.mxu0 %v104_v29  ;;  %577 = vmatpush3.msra.mxu1 %v146_v27 }
  0x10   :  { %586 = vmatpush3.msra.mxu0 %v136_v11  ;;  %578 = vmatprep.subr.mxu1 %v654_v3 }
  0x11   :  { %587 = vmatprep.subr.mxu0 %v654_v3  ;;  %579 = vmatpush3.msra.mxu1 %v153_v30 }
  0x12   :  { %588 = vmatpush3.msra.mxu0 %v143_v13  ;;  %580 = vmatprep.subr.mxu1 %v654_v3 }
  0x13   :  { %589 = vmatprep.subr.mxu0 %v654_v3  ;;  %581 = vmatpush3.msra.mxu1 %v160_v31 }
  0x14   :  { %590 = vmatpush3.msra.mxu0 %v150_v14  ;;  %583 = vmatmul.mubr.f32.vlgmr.msra.gmra.mxu1 %v708_v12 }
  0x15   :  { %591 = vmatprep.subr.mxu0 %v654_v3  ;;  %596 = vmatprep.subr.mxu1 %v654_v3 }
  0x16   :  { %592 = vmatpush3.msra.mxu0 %v157_v15  ;;  %597 = vmatpush3.msra.mxu1 %v687_v4 }
  0x17   :  { %593 = vmatprep.mubr.msk.f32.mxu0 %vm655_vm1, %v654_v3  ;;  %598 = vmatprep.subr.mxu1 %v654_v3 }
  0x18   :  { %607 = vmatprep.subr.mxu0 %v654_v3  ;;  %594 = vmatmul.mubr.f32.vlgmr.msra.gmra.mxu0 %v101_v17 }
  0x19   :  { %599 = vmatpush3.msra.mxu1 %v689_v5  ;;  %608 = vmatpush3.msra.mxu0 %v137_v16 }
  0x1a   :  { %600 = vmatprep.subr.mxu1 %v654_v3  ;;  %609 = vmatprep.subr.mxu0 %v654_v3 }
  0x1b   :  { %601 = vmatpush3.msra.mxu1 %v691_v6  ;;  %610 = vmatpush3.msra.mxu0 %v144_v18 }
  0x1c   :  { %602 = vmatprep.subr.mxu1 %v654_v3  ;;  %611 = vmatprep.subr.mxu0 %v654_v3 }
  0x1d   :  { %603 = vmatpush3.msra.mxu1 %v700_v9  ;;  %604 = vmatprep.mubr.msk.f32.mxu1 %vm655_vm1, %v654_v3 }
  0x1e   :  { %612 = vmatpush3.msra.mxu0 %v151_v19  ;;  %605 = vmatmul.mubr.f32.vlgmr.msra.gmra.mxu1 %v102_v22 }
  0x1f   :  { %613 = vmatprep.subr.mxu0 %v654_v3  ;;  %618 = vmatprep.subr.mxu1 %v654_v3 }
  0x20   :  { %614 = vmatpush3.msra.mxu0 %v158_v20  ;;  %615 = vmatprep.mubr.msk.f32.mxu0 %vm655_vm1, %v654_v3 }
  0x21   :  { %619 = vmatpush3.msra.mxu1 %v687_v4  ;;  %616 = vmatmul.mubr.f32.vlgmr.msra.gmra.mxu0 %v708_v12 }
  0x22   :  { %620 = vmatprep.subr.mxu1 %v654_v3  ;;  %626 = vmatprep.mubr.msk.f32.mxu1 %vm655_vm1, %v654_v3 }
  0x23   :  { %621 = vmatpush3.msra.mxu1 %v689_v5 }
  0x24   :  { %622 = vmatprep.subr.mxu1 %v654_v3 }
  0x25   :  { %623 = vmatpush3.msra.mxu1 %v691_v6 }
  0x26   :  { %624 = vmatprep.subr.mxu1 %v654_v3 }
  0x27   :  { %625 = vmatpush3.msra.mxu1 %v700_v9 }
  0x28   :  { %627 = vmatmul.mubr.f32.vlgmr.msra.gmra.mxu1 %v708_v12 }
  0xcf   :  { %v106_v32 = vpop.f32.mrf.mxu0 }
  0xd0   :  { %v107_v38 = vadd.f32 %v532_v35, %v106_v32 }
  0xd1   :  { %v573_v33 = vpop.f32.mrf.mxu0 }
  0xd4   :  { %v197_v34 = vpop.f32.mrf.mxu1 }
  0xd5   :  { %v198_v40 = vadd.f32 %v197_v34, %v107_v38 }
  0xd6   :  { %v584_v36 = vpop.f32.mrf.mxu1 }
  0xd8   :  { %v277_v37 = vpop.f32.mrf.mxu0 }
  0xd9   :  { %v278_v43 = vadd.f32 %v277_v37, %v198_v40 }
  0xda   :  { %v595_v39 = vpop.f32.mrf.mxu0 }
  0xde   :  { %v354_v41 = vpop.f32.mrf.mxu1 }
  0xdf   :  { %v355_v45 = vadd.f32 %v354_v41, %v278_v43 }
  0xe0   :  { %v606_v42 = vpop.f32.mrf.mxu1 }
  0xe1   :  { %v437_v44 = vpop.f32.mrf.mxu0 }
  0xe2   :  { %v438_v47 = vadd.f32 %v437_v44, %v355_v45 }
  0xe3   :  { %v617_v46 = vpop.f32.mrf.mxu0 }
  0xe8   :  { %v512_v48 = vpop.f32.mrf.mxu1 }
  0xe9   :  { %v513_v49 = vadd.f32 %v512_v48, %v438_v47 }
  0xea   :  { %v628_v50 = vpop.f32.mrf.mxu1 }
  0xeb   :  { %517 = vst.msk [vmem:[#allocation2] sm:$0xff] %vm516_vm2, %v513_v49 }
  0xec   :  { %643 = shalt.err (!%p640_p4)
}
  0xed   :  { %527 = dma.vmem_to_hbm [thread:$0]  %s525_s23, 128, %s767_s3, [#allocation3]  }
  0xee   :  { %652 = dma.done.wait [#allocation3], 128  }
  0xef   :  { %653 = vsyncadd [#allocation3], 4294967168 }
  0xf0   :  { %531 = vsyncpa [#allocation3], 1 }

// kernel: tpu_custom_call.1
= control target key start
LH: loop header
LB: loop body
LE: loop exit
PB: predicated region body
PF: predicated region fallthrough
CT: control target
= control target key end

     0   :  { %vm27_vm0 = vcmask 261120   ;;  %v654_v3 = vmov 0.0   ;;  %vm655_vm1 = vmmov 0   ;;  %s764_s0 = inlined_call_operand.vmem [shape: f32[8,32], index: 0, kind: input, shape index: {}]   ;;  %s765_s1 = inlined_call_operand.vmem [shape: f32[32,16], index: 1, kind: input, shape index: {}]   ;;  %s766_s2 = inlined_call_operand.vmem [shape: f32[1,16], index: 2, kind: input, shape index: {}]   ;;  %s767_s3 = inlined_call_operand.hbm [shape: f32[8,16], index: 3, kind: output, shape index: {}]  }
   0x1   :  { %v19_v0 = vld [vmem:[%s765_s1 + $0x18] sm:$0xff]  ;;  %v18_v1 = vld [vmem:[%s765_s1 + $0x10] sm:$0xff]  ;;  %v17_v2 = vld [vmem:[%s765_s1 + $0x8] sm:$0xff]  ;;  %563 = vmatprep.subr.mxu0 %v654_v3  ;;  %574 = vmatprep.subr.mxu1 %v654_v3 }
   0x2   :  { %v687_v4 = vand.u32 4294901760, %v19_v0  ;;  %v689_v5 = vand.u32 4294901760, %v18_v1  ;;  %v691_v6 = vand.u32 4294901760, %v17_v2  ;;  %v16_v7 = vld [vmem:[%s765_s1] sm:$0xff]  ;;  %571 = vmatprep.mubr.msk.f32.mxu0 %vm655_vm1, %v654_v3  ;;  %582 = vmatprep.mubr.msk.f32.mxu1 %vm655_vm1, %v654_v3 }
   0x3   :  { %v15_v8 = vld [vmem:[%s764_s0] sm:$0xff]  ;;  %v700_v9 = vand.u32 4294901760, %v16_v7 }
   0x4   :  { %v29_v10 = vsel %vm27_vm0, %v15_v8, 0 }
   0x5   :  { %8 = vsyncpa [#allocation3], 0  ;;  %564 = vmatpush3.msra.mxu0 %v687_v4  ;;  %v136_v11 = vsub.f32 %v19_v0, %v687_v4  ;;  %v708_v12 = vand.u32 4294901760, %v29_v10  ;;  %v143_v13 = vsub.f32 %v18_v1, %v689_v5  ;;  %v150_v14 = vsub.f32 %v17_v2, %v691_v6  ;;  %v532_v35 = vld [vmem:[%s766_s2] ss:$0 sm:$0xff]  ;;  %s656_s22 = smov [#allocation2]  }
   0x6   :  { %565 = vmatprep.subr.mxu0 %v654_v3  ;;  %v157_v15 = vsub.f32 %v16_v7, %v700_v9  ;;  %s524_s23 = sshll.u32 %s656_s22, 4  ;;  %vm516_vm2 = vcmask 130048   ;;  %s525_s23 = int_to_ptr.vmem [resolvable:$true] %s524_s23 }
   0x7   :  { %566 = vmatpush3.msra.mxu0 %v689_v5  ;;  %v137_v16 = vand.u32 4294901760, %v136_v11  ;;  %v101_v17 = vsub.f32 %v29_v10, %v708_v12  ;;  %v144_v18 = vand.u32 4294901760, %v143_v13  ;;  %v151_v19 = vand.u32 4294901760, %v150_v14  ;;  %s632_s2 = scalar_lea.vmem %s525_s23, 128  ;;  %p637_p1 = scmp.lt.s32.totalorder %s525_s23, %s525_s23 }
   0x8   :  { %567 = vmatprep.subr.mxu0 %v654_v3  ;;  %v158_v20 = vand.u32 4294901760, %v157_v15  ;;  %p633_p0 = scmp.ne.s32.totalorder %s525_s23, %s632_s2  ;;  %p638_p2 = scmp.lt.s32.totalorder %s632_s2, %s632_s2 }
   0x9   :  { %568 = vmatpush3.msra.mxu0 %v691_v6  ;;  %v138_v21 = vsub.f32 %v136_v11, %v137_v16  ;;  %v102_v22 = vand.u32 4294901760, %v101_v17  ;;  %v145_v23 = vsub.f32 %v143_v13, %v144_v18  ;;  %v152_v24 = vsub.f32 %v150_v14, %v151_v19 }
   0xa   :  { %569 = vmatprep.subr.mxu0 %v654_v3  ;;  %v159_v28 = vsub.f32 %v157_v15, %v158_v20  ;;  %p639_p3 = por %p638_p2, %p637_p1 }
   0xb   :  { %570 = vmatpush3.msra.mxu0 %v700_v9  ;;  %v139_v25 = vand.u32 4294901760, %v138_v21  ;;  %v103_v26 = vsub.f32 %v101_v17, %v102_v22  ;;  %v146_v27 = vand.u32 4294901760, %v145_v23  ;;  %v153_v30 = vand.u32 4294901760, %v152_v24 }
   0xc   :  { %585 = vmatprep.subr.mxu0 %v654_v3  ;;  %v160_v31 = vand.u32 4294901760, %v159_v28  ;;  %p640_p4 = pnand %p639_p3, %p633_p0 }
   0xd   :  { %575 = vmatpush3.msra.mxu1 %v139_v25  ;;  %v104_v29 = vand.u32 4294901760, %v103_v26 }
   0xe   :  { %576 = vmatprep.subr.mxu1 %v654_v3 }
   0xf   :  { %572 = vmatmul.mubr.f32.vlgmr.msra.gmra.mxu0 %v104_v29  ;;  %577 = vmatpush3.msra.mxu1 %v146_v27 }
  0x10   :  { %586 = vmatpush3.msra.mxu0 %v136_v11  ;;  %578 = vmatprep.subr.mxu1 %v654_v3 }
  0x11   :  { %587 = vmatprep.subr.mxu0 %v654_v3  ;;  %579 = vmatpush3.msra.mxu1 %v153_v30 }
  0x12   :  { %588 = vmatpush3.msra.mxu0 %v143_v13  ;;  %580 = vmatprep.subr.mxu1 %v654_v3 }
  0x13   :  { %589 = vmatprep.subr.mxu0 %v654_v3  ;;  %581 = vmatpush3.msra.mxu1 %v160_v31 }
  0x14   :  { %590 = vmatpush3.msra.mxu0 %v150_v14  ;;  %583 = vmatmul.mubr.f32.vlgmr.msra.gmra.mxu1 %v708_v12 }
  0x15   :  { %591 = vmatprep.subr.mxu0 %v654_v3  ;;  %596 = vmatprep.subr.mxu1 %v654_v3 }
  0x16   :  { %592 = vmatpush3.msra.mxu0 %v157_v15  ;;  %597 = vmatpush3.msra.mxu1 %v687_v4 }
  0x17   :  { %593 = vmatprep.mubr.msk.f32.mxu0 %vm655_vm1, %v654_v3  ;;  %598 = vmatprep.subr.mxu1 %v654_v3 }
  0x18   :  { %607 = vmatprep.subr.mxu0 %v654_v3  ;;  %594 = vmatmul.mubr.f32.vlgmr.msra.gmra.mxu0 %v101_v17 }
  0x19   :  { %599 = vmatpush3.msra.mxu1 %v689_v5  ;;  %608 = vmatpush3.msra.mxu0 %v137_v16 }
  0x1a   :  { %600 = vmatprep.subr.mxu1 %v654_v3  ;;  %609 = vmatprep.subr.mxu0 %v654_v3 }
  0x1b   :  { %601 = vmatpush3.msra.mxu1 %v691_v6  ;;  %610 = vmatpush3.msra.mxu0 %v144_v18 }
  0x1c   :  { %602 = vmatprep.subr.mxu1 %v654_v3  ;;  %611 = vmatprep.subr.mxu0 %v654_v3 }
  0x1d   :  { %603 = vmatpush3.msra.mxu1 %v700_v9  ;;  %604 = vmatprep.mubr.msk.f32.mxu1 %vm655_vm1, %v654_v3 }
  0x1e   :  { %612 = vmatpush3.msra.mxu0 %v151_v19  ;;  %605 = vmatmul.mubr.f32.vlgmr.msra.gmra.mxu1 %v102_v22 }
  0x1f   :  { %613 = vmatprep.subr.mxu0 %v654_v3  ;;  %618 = vmatprep.subr.mxu1 %v654_v3 }
  0x20   :  { %614 = vmatpush3.msra.mxu0 %v158_v20  ;;  %615 = vmatprep.mubr.msk.f32.mxu0 %vm655_vm1, %v654_v3 }
  0x21   :  { %619 = vmatpush3.msra.mxu1 %v687_v4  ;;  %616 = vmatmul.mubr.f32.vlgmr.msra.gmra.mxu0 %v708_v12 }
  0x22   :  { %620 = vmatprep.subr.mxu1 %v654_v3  ;;  %626 = vmatprep.mubr.msk.f32.mxu1 %vm655_vm1, %v654_v3 }
  0x23   :  { %621 = vmatpush3.msra.mxu1 %v689_v5 }
  0x24   :  { %622 = vmatprep.subr.mxu1 %v654_v3 }
  0x25   :  { %623 = vmatpush3.msra.mxu1 %v691_v6 }
  0x26   :  { %624 = vmatprep.subr.mxu1 %v654_v3 }
  0x27   :  { %625 = vmatpush3.msra.mxu1 %v700_v9 }
  0x28   :  { %627 = vmatmul.mubr.f32.vlgmr.msra.gmra.mxu1 %v708_v12 }
  0xcf   :  { %v106_v32 = vpop.f32.mrf.mxu0 }
  0xd0   :  { %v107_v38 = vadd.f32 %v532_v35, %v106_v32 }
  0xd1   :  { %v573_v33 = vpop.f32.mrf.mxu0 }
  0xd4   :  { %v197_v34 = vpop.f32.mrf.mxu1 }
  0xd5   :  { %v198_v40 = vadd.f32 %v197_v34, %v107_v38 }
  0xd6   :  { %v584_v36 = vpop.f32.mrf.mxu1 }
  0xd8   :  { %v277_v37 = vpop.f32.mrf.mxu0 }
  0xd9   :  { %v278_v43 = vadd.f32 %v277_v37, %v198_v40 }
  0xda   :  { %v595_v39 = vpop.f32.mrf.mxu0 }
  0xde   :  { %v354_v41 = vpop.f32.mrf.mxu1 }
  0xdf   :  { %v355_v45 = vadd.f32 %v354_v41, %v278_v43 }
  0xe0   :  { %v606_v42 = vpop.f32.mrf.mxu1 }
  0xe1   :  { %v437_v44 = vpop.f32.mrf.mxu0 }
  0xe2   :  { %v438_v47 = vadd.f32 %v437_v44, %v355_v45 }
  0xe3   :  { %v617_v46 = vpop.f32.mrf.mxu0 }
  0xe8   :  { %v512_v48 = vpop.f32.mrf.mxu1 }
  0xe9   :  { %v513_v49 = vadd.f32 %v512_v48, %v438_v47 }
  0xea   :  { %v628_v50 = vpop.f32.mrf.mxu1 }
  0xeb   :  { %517 = vst.msk [vmem:[#allocation2] sm:$0xff] %vm516_vm2, %v513_v49 }
  0xec   :  { %643 = shalt.err (!%p640_p4)
}
  0xed   :  { %527 = dma.vmem_to_hbm [thread:$0]  %s525_s23, 128, %s767_s3, [#allocation3]  }
  0xee   :  { %652 = dma.done.wait [#allocation3], 128  }
  0xef   :  { %653 = vsyncadd [#allocation3], 4294967168 }
  0xf0   :  { %531 = vsyncpa [#allocation3], 1 }

</bundles_post_ra>
